<compile_context>
chip_gen: v7x
topology: tpu7x:2x2x1
jax: 0.10.0
libtpu: 0.0.40
codegen_flags: <defaults>
</compile_context>

<pallas_src>
import functools

import jax
import jax.numpy as jnp
from jax.experimental import pallas as pl
from jax.experimental.pallas import tpu as pltpu


def _round_up(x, m):
    return (x + m - 1) // m * m


def _hnn_kernel(x_ref, w_ref, b_ref, o_ref):
    # x_ref: (tm, K) input rows (f32), w_ref: (K, tn) packed weight tile (bf16 or f32),
    # b_ref: (1, tn) f32 bias, o_ref: (tm, tn) output.
    x = x_ref[...].astype(w_ref.dtype)            # cheap VPU cast; MXU runs in w dtype
    acc = jnp.dot(x, w_ref[...], preferred_element_type=jnp.float32)
    o_ref[...] = jax.nn.sigmoid(acc + b_ref[...]).astype(o_ref.dtype)


def prepare_params(weight, bias, compute_dtype=jnp.bfloat16):
    """Pack nn.Linear params once (init time, outside the hot path).

    weight: (N, K) PyTorch nn.Linear layout, bias: (N,).
    Returns (w_packed, b_packed, n_out):
      w_packed: (K, N_pad)  pre-transposed, lane-padded to a 128 multiple, compute_dtype
      b_packed: (1, N_pad)  float32
    K is intentionally NOT padded: the kernel consumes it as a full-array block dim,
    so activations never need a per-call jnp.pad.
    """
    N, K = weight.shape
    N_pad = _round_up(N, 128)
    w_packed = jnp.zeros((K, N_pad), compute_dtype).at[:, :N].set(
        weight.T.astype(compute_dtype))
    b_packed = jnp.zeros((1, N_pad), jnp.float32).at[0, :N].set(
        bias.astype(jnp.float32))
    return w_packed, b_packed, N


def _vmem_limit_bytes():
    """Generation-aware scoped-VMEM limit (conservative fallback = 64 MiB = v7x per-TC)."""
    phys = 64 * 1024 * 1024
    try:
        cap = getattr(pltpu.get_tpu_info(), "vmem_capacity_bytes", None)
        if cap:
            phys = int(cap)
    except Exception:
        pass
    return max(32 * 1024 * 1024, min(phys * 3 // 4, 96 * 1024 * 1024))


def _select_tiles(M, K, N_pad, w_itemsize, budget_bytes):
    """Pick (tm, tn): prefer tn == N_pad (weight fully VMEM-resident); cap tm so big
    batches give >= 2 row blocks (v7x megacore sharding)."""
    tm = min(512, _round_up(M, 8))
    if M >= 256:
        tm = min(tm, _round_up((M + 1) // 2, 8))

    def fits(tm_, tn_):
        x_b = 2 * tm_ * K * 4             # double-buffered f32 x tile
        w_b = 2 * K * tn_ * w_itemsize    # weight tile (resident when tn_ == N_pad)
        b_b = 2 * tn_ * 4
        o_b = 2 * tm_ * tn_ * 4
        return x_b + w_b + b_b + o_b <= budget_bytes

    tn = N_pad
    while tn > 128 and not fits(tm, tn):
        tn = max(128, _round_up(tn // 2, 128))
    while tm > 8 and not fits(tm, tn):
        tm = max(8, _round_up(tm // 2, 8))
    return tm, tn


@functools.partial(jax.jit, static_argnames=("n_out", "tm_max", "tn_max"))
def hnn_forward_packed(x, w_packed, b_packed, *, n_out, tm_max=None, tn_max=None):
    """x: (M, K) float32; w_packed/b_packed from prepare_params()."""
    M, K = x.shape
    Kw, N_pad = w_packed.shape
    if Kw != K:
        raise ValueError(f"feature mismatch: x has K={K}, packed weight has K={Kw}")

    vmem_limit = _vmem_limit_bytes()
    w_itemsize = jnp.dtype(w_packed.dtype).itemsize
    tm, tn = _select_tiles(M, K, N_pad, w_itemsize,
                           budget_bytes=int(vmem_limit * 0.85))
    if tm_max is not None:
        tm = min(tm, max(8, _round_up(tm_max, 8)))
    if tn_max is not None:
        tn = min(tn, max(128, _round_up(tn_max, 128)))

    nj = pl.cdiv(N_pad, tn)   # weight-column tiles (OUTER axis -> each W tile read once)
    ni = pl.cdiv(M, tm)       # row tiles (inner axis)

    cost = pl.CostEstimate(
        flops=2 * M * K * N_pad,
        transcendentals=M * N_pad,
        bytes_accessed=(4 * M * K * nj                      # x streamed once per W tile
                        + w_itemsize * K * N_pad            # weight read exactly once
                        + 4 * (M * N_pad + N_pad)),
    )

    out = pl.pallas_call(
        _hnn_kernel,
        out_shape=jax.ShapeDtypeStruct((M, N_pad), x.dtype),
        grid_spec=pltpu.PrefetchScalarGridSpec(
            num_scalar_prefetch=0,
            grid=(nj, ni),
            in_specs=[
                pl.BlockSpec((tm, K), lambda j, i: (i, 0)),   # x rows, full (unpadded) K
                pl.BlockSpec((K, tn), lambda j, i: (0, j)),   # weight: row-index free
                pl.BlockSpec((1, tn), lambda j, i: (0, j)),   # bias
            ],
            out_specs=pl.BlockSpec((tm, tn), lambda j, i: (i, j)),
        ),
        compiler_params=pltpu.CompilerParams(
            dimension_semantics=("parallel", "parallel"),
            vmem_limit_bytes=int(vmem_limit),
        ),
        cost_estimate=cost,
    )(x, w_packed, b_packed)

    # Strip lane padding only when the caller needs the exact PyTorch shape.
    # TODO(synk): let downstream consumers take the padded (M, N_pad) slab to skip this copy.
    return out[:, :n_out] if n_out != N_pad else out


def hnn_forward(x, weight, bias, compute_dtype=jnp.bfloat16):
    """Convenience entry taking PyTorch-layout (N, K) weight / (N,) bias.
    Packs per call; real models should call prepare_params() once at init time."""
    w_packed, b_packed, n_out = prepare_params(weight, bias, compute_dtype)
    return hnn_forward_packed(x, w_packed, b_packed, n_out=n_out)


def hnn_reference(x, weight, bias):
    return jax.nn.sigmoid(x @ weight.T + bias)


if __name__ == "__main__":
    key = jax.random.PRNGKey(0)
    k_x, k_w, k_b, k_x2, k_w2, k_b2 = jax.random.split(key, 6)

    # --- Test 1: HNN-sized layer, bf16 weight-resident fast path + f32 path ------
    batch, inp, outp = 16, 64, 32
    x = jax.random.normal(k_x, (batch, inp), dtype=jnp.float32)
    bound = 1.0 / (inp ** 0.5)
    weight = jax.random.uniform(k_w, (outp, inp), jnp.float32, -bound, bound)
    bias = jax.random.uniform(k_b, (outp,), jnp.float32, -bound, bound)

    ref = hnn_reference(x, weight, bias)

    out_bf16 = jax.block_until_ready(hnn_forward(x, weight, bias))   # bf16 compute
    assert out_bf16.shape == (batch, outp)
    assert jnp.allclose(out_bf16, ref, atol=2e-2, rtol=2e-2)

    wp32, bp32, n_out = prepare_params(weight, bias, compute_dtype=jnp.float32)
    out_f32 = jax.block_until_ready(hnn_forward_packed(x, wp32, bp32, n_out=n_out))
    assert out_f32.shape == (batch, outp)
    assert jnp.allclose(out_f32, ref, atol=1e-5, rtol=1e-5)

    # --- Test 2: multi-block grid (ragged rows, tiled N, unpadded K=96), f32 -----
    batch2, inp2, outp2 = 40, 96, 160
    x2 = jax.random.normal(k_x2, (batch2, inp2), dtype=jnp.float32)
    bound2 = 1.0 / (inp2 ** 0.5)
    weight2 = jax.random.uniform(k_w2, (outp2, inp2), jnp.float32, -bound2, bound2)
    bias2 = jax.random.uniform(k_b2, (outp2,), jnp.float32, -bound2, bound2)

    wp2, bp2, n_out2 = prepare_params(weight2, bias2, compute_dtype=jnp.float32)
    out2 = jax.block_until_ready(
        hnn_forward_packed(x2, wp2, bp2, n_out=n_out2, tm_max=16, tn_max=128))
    ref2 = hnn_reference(x2, weight2, bias2)
    assert out2.shape == (batch2, outp2)
    assert jnp.allclose(out2, ref2, atol=1e-4, rtol=1e-4)

    print("KERNEL_OK")
</pallas_src>

<mosaic_0001>
module attributes {stable_mosaic.version = 11 : i64} {
  func.func @_hnn_kernel(%arg0: i32, %arg1: i32, %arg2: memref<16x64xf32, #tpu.memory_space<vmem>>, %arg3: memref<64x128xbf16, #tpu.memory_space<vmem>>, %arg4: memref<1x128xf32, #tpu.memory_space<vmem>>, %arg5: memref<16x128xf32, #tpu.memory_space<vmem>>) attributes {dimension_semantics = [#tpu.dimension_semantics<parallel>, #tpu.dimension_semantics<parallel>], iteration_bounds = array<i64: 1, 1>, scalar_prefetch = 0 : i64, scratch_operands = 0 : i64, tpu.core_type = #tpu.core_type<tc>, window_params = [{transform_indices = @transform_0, window_bounds = array<i64: 16, 64>}, {transform_indices = @transform_1, window_bounds = array<i64: 64, 128>}, {transform_indices = @transform_2, window_bounds = array<i64: 1, 128>}, {transform_indices = @transform_3, window_bounds = array<i64: 16, 128>}]} {
    %c0 = arith.constant 0 : index
    %c0_0 = arith.constant 0 : index
    %0 = vector.load %arg2[%c0, %c0_0] : memref<16x64xf32, #tpu.memory_space<vmem>>, vector<16x64xf32>
    %1 = arith.truncf %0 : vector<16x64xf32> to vector<16x64xbf16>
    %c0_1 = arith.constant 0 : index
    %c0_2 = arith.constant 0 : index
    %2 = vector.load %arg3[%c0_1, %c0_2] : memref<64x128xbf16, #tpu.memory_space<vmem>>, vector<64x128xbf16>
    %cst = arith.constant dense<0.000000e+00> : vector<16x128xf32>
    %3 = tpu.matmul %1, %2, %cst {dimension_numbers = #tpu.dot_dimension_numbers<[1], [0], [0], [1], [0, 0, 1, 1], [], []>} : vector<16x64xbf16>, vector<64x128xbf16>, vector<16x128xf32> -> vector<16x128xf32>
    %c0_3 = arith.constant 0 : index
    %c0_4 = arith.constant 0 : index
    %4 = vector.load %arg4[%c0_3, %c0_4] : memref<1x128xf32, #tpu.memory_space<vmem>>, vector<1x128xf32>
    %5 = vector.broadcast %4 : vector<1x128xf32> to vector<16x128xf32>
    %6 = arith.addf %3, %5 : vector<16x128xf32>
    %7 = arith.negf %6 : vector<16x128xf32>
    %8 = math.exp %7 : vector<16x128xf32>
    %cst_5 = arith.constant 1.000000e+00 : f32
    %9 = vector.broadcast %cst_5 : f32 to vector<16x128xf32>
    %10 = arith.addf %9, %8 : vector<16x128xf32>
    %11 = arith.divf %9, %10 : vector<16x128xf32>
    %c0_6 = arith.constant 0 : index
    %c0_7 = arith.constant 0 : index
    %12 = vector.load %arg5[%c0_6, %c0_7] : memref<16x128xf32, #tpu.memory_space<vmem>>, vector<16x128xf32>
    tpu.vector_store %arg5[%c0_6, %c0_7], %11 {strides = array<i32>} : memref<16x128xf32, #tpu.memory_space<vmem>>, vector<16x128xf32>,
    return
  }
  func.func @transform_0(%arg0: i32, %arg1: i32) -> (i32, i32) {
    %c0_i32 = arith.constant 0 : i32
    %c0_i32_0 = arith.constant 0 : i32
    return %arg1, %c0_i32 : i32, i32
  }
  func.func @transform_1(%arg0: i32, %arg1: i32) -> (i32, i32) {
    %c0_i32 = arith.constant 0 : i32
    %c0_i32_0 = arith.constant 0 : i32
    return %c0_i32, %arg0 : i32, i32
  }
  func.func @transform_2(%arg0: i32, %arg1: i32) -> (i32, i32) {
    %c0_i32 = arith.constant 0 : i32
    %c0_i32_0 = arith.constant 0 : i32
    return %c0_i32, %arg0 : i32, i32
  }
  func.func @transform_3(%arg0: i32, %arg1: i32) -> (i32, i32) {
    %c0_i32 = arith.constant 0 : i32
    return %arg1, %arg0 : i32, i32
  }
}

</mosaic_0001>

<bundles_post_ra>
// kernel: hnn_forward_packed.1
= control target key start
LH: loop header
LB: loop body
LE: loop exit
PB: predicated region body
PF: predicated region fallthrough
CT: control target
= control target key end

     0   :  { %8 = vsyncpa [#allocation3], 0  ;;  %s355_s0 = inlined_call_operand.hbm [shape: f32[16,64], index: 0, kind: input, shape index: {}]   ;;  %s356_s1 = inlined_call_operand.hbm [shape: bf16[64,128], index: 1, kind: input, shape index: {}]   ;;  %s357_s2 = inlined_call_operand.vmem [shape: f32[1,128], index: 2, kind: input, shape index: {}]   ;;  %s358_s3 = inlined_call_operand.hbm [shape: f32[16,128], index: 3, kind: output, shape index: {}]  }
   0x1   :  { %9 = vsyncpa [#allocation6], 0 }
   0x2   :  { %10 = vsyncpa [#allocation4], 0  ;;  %s281_s12 = smov [#allocation2]   ;;  %s209_s16 = scalar_lea.hbm %s355_s0, 256 }
   0x3   :  { %s16_s13 = sshll.u32 %s281_s12, 4  ;;  %p210_p0 = scmp.ne.s32.totalorder %s355_s0, %s209_s16  ;;  %s17_s13 = int_to_ptr.vmem [resolvable:$true] %s16_s13 }
   0x4   :  { %p213_p1 = scmp.lt.u32.totalorder %s209_s16, %s355_s0 }
   0x6   :  { %p215_p2 = pnand %p213_p1, %p210_p0 }
   0x8   :  { %218 = shalt.err (!%p215_p2)
}
   0x9   :  { %s219_s21 = scalar_lea.vmem %s17_s13, 256  ;;  %p224_p4 = scmp.lt.s32.totalorder %s17_s13, %s17_s13 }
   0xa   :  { %p220_p3 = scmp.ne.s32.totalorder %s17_s13, %s219_s21  ;;  %p225_p5 = scmp.lt.s32.totalorder %s219_s21, %s219_s21 }
   0xc   :  { %p226_p6 = por %p225_p5, %p224_p4 }
   0xe   :  { %p227_p7 = pnand %p226_p6, %p220_p3 }
  0x10   :  { %230 = shalt.err (!%p227_p7)
}
  0x11   :  { %s282_s22 = smov 128   ;;  %s283_s23 = smov 8  }
  0x12   :  { %22 = dma.hbm_to_vmem [thread:$0]  %s355_s0, 256, %s17_s13, [#allocation3], %s282_s22, %s282_s22, %s283_s23  }
  0x13   :  { %s284_s26 = smov [#allocation5]   ;;  %s231_s30 = scalar_lea.hbm %s356_s1, 512 }
  0x14   :  { %s28_s27 = sshll.u32 %s284_s26, 4  ;;  %p232_p8 = scmp.ne.s32.totalorder %s356_s1, %s231_s30  ;;  %s29_s27 = int_to_ptr.vmem [resolvable:$true] %s28_s27 }
  0x15   :  { %p235_p9 = scmp.lt.u32.totalorder %s231_s30, %s356_s1 }
  0x17   :  { %p237_p10 = pnand %p235_p9, %p232_p8 }
  0x19   :  { %240 = shalt.err (!%p237_p10)
}
  0x1a   :  { %s241_s8 = scalar_lea.vmem %s29_s27, 512  ;;  %p246_p12 = scmp.lt.s32.totalorder %s29_s27, %s29_s27 }
  0x1b   :  { %p242_p11 = scmp.ne.s32.totalorder %s29_s27, %s241_s8  ;;  %p247_p13 = scmp.lt.s32.totalorder %s241_s8, %s241_s8 }
  0x1d   :  { %p248_p0 = por %p247_p13, %p246_p12 }
  0x1f   :  { %p249_p1 = pnand %p248_p0, %p242_p11 }
  0x21   :  { %252 = shalt.err (!%p249_p1)
}
  0x22   :  { %s285_s0 = smov 64   ;;  %s286_s9 = smov 4  }
  0x23   :  { %34 = dma.hbm_to_vmem [thread:$0]  %s356_s1, 512, %s29_s27, [#allocation6], %s285_s0, %s285_s0, %s286_s9  }
  0x24   :  { %275 = dma.done.wait [#allocation3], 256  }
  0x25   :  { %276 = vsyncadd [#allocation3], 4294967040 }
  0x26   :  { %277 = dma.done.wait [#allocation6], 512  }
  0x27   :  { %278 = vsyncadd [#allocation6], 4294966784  ;;  %v287_v0 = vmov 0.0   ;;  %vm288_vm0 = vmmov 0   ;;  %v197_v1 = vld [vmem:[#allocation5] sm:$0xff]   ;;  %v198_v2 = vld [vmem:[#allocation5 + $0x8] sm:$0xff]  }
  0x28   :  { %176 = vmatprep.subr.bf16.mxu0 %v287_v0  ;;  %184 = vmatprep.mubr.msk.bf16.mxu0 %vm288_vm0, %v287_v0  ;;  %v199_v3 = vld [vmem:[#allocation5 + $0x10] sm:$0xff]   ;;  %v200_v4 = vld [vmem:[#allocation5 + $0x18] sm:$0xff]   ;;  %vm86_vm1 = vcmask 523264   ;;  %s289_s13 = smov [#allocation7]  }
  0x29   :  { %177 = vmatpush3.bf16.msra.mxu0 %v197_v1  ;;  %v44_v5 = vld [vmem:[#allocation2] sm:$0xff]  ;;  %v45_v6 = vld [vmem:[#allocation2 + $0x8] sm:$0xff]  ;;  %s150_s14 = sshll.u32 %s289_s13, 4  ;;  %s151_s14 = int_to_ptr.vmem [resolvable:$true] %s150_s14 }
  0x2a   :  { %178 = vmatprep.subr.bf16.mxu0 %v287_v0  ;;  %v46_v7 = vpack.c.bf16 %v45_v6, %v44_v5  ;;  %v163_v8 = vld [vmem:[%s357_s2] ss:$0 sm:$0xff]  ;;  %s253_s2 = scalar_lea.vmem %s151_s14, 256  ;;  %p258_p3 = scmp.lt.s32.totalorder %s151_s14, %s151_s14 }
  0x2b   :  { %p254_p2 = scmp.ne.s32.totalorder %s151_s14, %s253_s2  ;;  %p259_p4 = scmp.lt.s32.totalorder %s253_s2, %s253_s2 }
  0x2d   :  { %179 = vmatpush3.bf16.msra.mxu0 %v198_v2  ;;  %p260_p5 = por %p259_p4, %p258_p3 }
  0x2e   :  { %180 = vmatprep.subr.bf16.mxu0 %v287_v0 }
  0x2f   :  { %p261_p6 = pnand %p260_p5, %p254_p2 }
  0x31   :  { %181 = vmatpush3.bf16.msra.mxu0 %v199_v3 }
  0x32   :  { %182 = vmatprep.subr.bf16.mxu0 %v287_v0 }
  0x35   :  { %183 = vmatpush3.bf16.msra.mxu0 %v200_v4 }
  0x38   :  { %185 = vmatmul.mubr.msk.bf16.vlgmr.msra.gmra.mrb[0].mxu0 %vm86_vm1, %v46_v7 }
 0x10b   :  { %v124_v9 = vpop.f32.mrb[0].mxu0 }
 0x10c   :  { %v125_v10 = vadd.f32 %v163_v8, %v124_v9  ;;  %v186_v11 = vpop.f32.mrb[1].mxu0 }
 0x10d   :  { %v127_v12 = vpop.f32.mrb[2].mxu0 }
 0x10e   :  { %v169_v13 = vmul.f32 -1.442695, %v125_v10  ;;  %v128_v14 = vadd.f32 %v163_v8, %v127_v12  ;;  %v187_v15 = vpop.f32.mrb[3].mxu0 }
 0x110   :  { %201 = vpow2.f32 %v169_v13  ;;  %v170_v16 = vmul.f32 -1.442695, %v128_v14 }
 0x112   :  { %203 = vpow2.f32 %v170_v16 }
 0x11a   :  { %v202_v17 = vpop.eup %201 }
 0x11b   :  { %v137_v18 = vadd.f32 1.0, %v202_v17 }
 0x11c   :  { %v204_v19 = vpop.eup %203 }
 0x11d   :  { %205 = vrcp.f32 %v137_v18  ;;  %v138_v20 = vadd.f32 1.0, %v204_v19 }
 0x11f   :  { %207 = vrcp.f32 %v138_v20 }
 0x127   :  { %v206_v21 = vpop.eup %205 }
 0x128   :  { %143 = vst [vmem:[#allocation7] sm:$0xff] %v206_v21 }
 0x129   :  { %v208_v22 = vpop.eup %207 }
 0x12a   :  { %144 = vst [vmem:[#allocation7 + $0x8] sm:$0xff] %v208_v22 }
 0x12b   :  { %264 = shalt.err (!%p261_p6)
}
 0x12c   :  { %s265_s17 = scalar_lea.hbm %s358_s3, 256 }
 0x12d   :  { %p266_p7 = scmp.ne.s32.totalorder %s358_s3, %s265_s17  ;;  %p269_p8 = scmp.lt.u32.totalorder %s265_s17, %s358_s3 }
 0x12f   :  { %p271_p9 = pnand %p269_p8, %p266_p7 }
 0x131   :  { %274 = shalt.err (!%p271_p9)
}
 0x132   :  { %156 = dma.vmem_to_hbm [thread:$0]  %s151_s14, 256, %s358_s3, [#allocation4], %s282_s22, %s282_s22, %s283_s23  }
 0x133   :  { %279 = dma.done.wait [#allocation4], 256  }
 0x134   :  { %280 = vsyncadd [#allocation4], 4294967040 }
 0x135   :  { %160 = vsyncpa [#allocation3], 1 }
 0x136   :  { %161 = vsyncpa [#allocation6], 1 }
 0x137   :  { %162 = vsyncpa [#allocation4], 1 }

</bundles_post_ra>
